<compile_context>
chip_gen: v7x
topology: tpu7x:2x2x1
jax: 0.10.0
libtpu: 0.0.40
codegen_flags: <defaults>
</compile_context>

<pallas_src>
import functools

import jax
import jax.numpy as jnp
from jax import lax
from jax.experimental import pallas as pl
from jax.experimental.pallas import tpu as pltpu


def _round_up(x, m):
    return (x + m - 1) // m * m


# ---------------------------------------------------------------------------
# Kernel
# ---------------------------------------------------------------------------
def _attention_mb_kernel(nvalid_ref,                                   # scalar prefetch (SMEM)
                         h_ref, wfc_ref, bfc_ref, wab_ref, bab_ref, wct_ref, bc_ref,
                         m_out, l_out, acc_out, araw_ref,
                         m_sc, l_sc, acc_sc,
                         *, d_attn, tiles_per_split):
    i = pl.program_id(0)          # reduction split (one per TensorCore on v7x)
    j = pl.program_id(1)          # N-tile within this split
    tn = h_ref.shape[0]
    n_valid = nvalid_ref[0]

    # ---- init this split's online-softmax accumulators ----------------------
    @pl.when(j == 0)
    def _init():
        m_sc[...] = jnp.full(m_sc.shape, -jnp.inf, m_sc.dtype)
        l_sc[...] = jnp.zeros(l_sc.shape, l_sc.dtype)
        acc_sc[...] = jnp.zeros(acc_sc.shape, acc_sc.dtype)

    # ---- fc: Linear(F, L) + ReLU (dropout = identity) ------------------------
    # bf16 MXU operands, f32 accumulation / elementwise.
    h1 = jnp.dot(h_ref[...], wfc_ref[...],
                 preferred_element_type=jnp.float32) + bfc_ref[...]
    h1 = jnp.maximum(h1, 0.0)                                          # (TN, L) f32

    # ---- Attn_Net_Gated: fused a|b projection (one bf16 (L,2D) matmul) -------
    ab = jnp.dot(h1.astype(jnp.bfloat16), wab_ref[...],
                 preferred_element_type=jnp.float32) + bab_ref[...]    # (TN, 2D) f32
    gated = jnp.tanh(ab[:, :d_attn]) * jax.nn.sigmoid(ab[:, d_attn:])  # (TN, D) f32

    # attention scores directly in (C, TN) layout (N lane-dense; no transpose)
    a_cn = lax.dot_general(wct_ref[...], gated,
                           dimension_numbers=(((1,), (1,)), ((), ())),
                           preferred_element_type=jnp.float32) + bc_ref[...]   # (C, TN)
    araw_ref[...] = a_cn

    # ---- padding mask: (1, TN) iota broadcast over C --------------------------
    col0 = (i * tiles_per_split + j) * tn
    col = col0 + lax.broadcasted_iota(jnp.int32, (1, tn), 1)
    s = jnp.where(col < n_valid, a_cn, -jnp.inf)                       # (C, TN)

    # ---- online softmax over N + running M accumulator (f32 stats) ------------
    m_prev = m_sc[...]
    m_new = jnp.maximum(m_prev, jnp.max(s, axis=1, keepdims=True))     # (C, 1)
    m_safe = jnp.where(m_new == -jnp.inf, 0.0, m_new)                  # guard fully-masked tile
    alpha = jnp.exp(m_prev - m_safe)                                   # (C, 1)
    p = jnp.exp(s - m_safe)                                            # (C, TN); padded -> 0
    l_sc[...] = alpha * l_sc[...] + jnp.sum(p, axis=1, keepdims=True)
    acc_sc[...] = alpha * acc_sc[...] + jnp.dot(p, h1, preferred_element_type=jnp.float32)
    m_sc[...] = m_new

    # ---- emit this split's partial (m, l, acc) on its last tile ---------------
    @pl.when(j == tiles_per_split - 1)
    def _fin():
        m_out[...] = m_sc[...].reshape(m_out.shape)
        l_out[...] = l_sc[...].reshape(l_out.shape)
        acc_out[...] = acc_sc[...].reshape(acc_out.shape)


# ---------------------------------------------------------------------------
# Wrapper
# ---------------------------------------------------------------------------
def prepare_params(params):
    """One-time parameter prep (hoisted out of the forward): fuse the a|b projections,
    transpose w_c to (C, D), reshape biases, and cast the two big MXU weights to bf16."""
    return {
        "w_fc": params["w_fc"].astype(jnp.bfloat16),                              # (F, L)
        "b_fc": params["b_fc"].astype(jnp.float32),                               # (1, L)
        "w_ab": jnp.concatenate([params["w_a"], params["w_b"]], axis=1
                                ).astype(jnp.bfloat16),                           # (L, 2D)
        "b_ab": jnp.concatenate([params["b_a"], params["b_b"]], axis=1
                                ).astype(jnp.float32),                            # (1, 2D)
        "w_ct": params["w_c"].T.astype(jnp.float32),                              # (C, D)
        "b_c": params["b_c"].reshape(-1, 1).astype(jnp.float32),                  # (C, 1)
        "w_cls": params["w_cls"].astype(jnp.float32),                             # (C, L)
        "b_cls": params["b_cls"].astype(jnp.float32),                             # (1, C)
    }


def _vmem_bytes_estimate(tn, F, L, D, C):
    return int(
        2 * tn * F * 2                          # h double buffer (bf16)
        + 2 * C * tn * 4                        # A_raw output blocks (double buffered)
        + (F * L + L * 2 * D) * 2               # resident bf16 weights
        + (C * D + L + 2 * D + C) * 4           # resident f32 weights / biases
        + tn * (L * 6 + 2 * D * 4 + D * 4)      # h1 (f32 + bf16 copy), ab, gated
        + 3 * C * tn * 4                        # a_cn / s / p
        + C * (2 + L) * 4)                      # scratch accumulators


def attention_mb_forward(h, prep, *, block_n=1024, n_splits=2):
    """h: (N, F) float32 bag.  prep: output of prepare_params.

    n_splits=2 maps the N reduction onto both TensorCores on v7x (megacore); on 1-TC parts
    (v5e / v6e) it degenerates to a harmless serial split.
    """
    N, F = h.shape
    L = prep["w_fc"].shape[1]
    D = prep["w_ab"].shape[1] // 2
    C = prep["w_ct"].shape[0]

    # --- generation-aware VMEM budget (64 MiB v7x / 128 MiB v5e-v6e) ----------
    try:
        vmem_cap = int(pltpu.get_tpu_info().vmem_capacity_bytes)
    except Exception:
        vmem_cap = 64 * 1024 * 1024
    vmem_budget = int(0.75 * vmem_cap)

    # --- N tile: multiple of 128, shrunk if the estimate exceeds the budget ----
    tn = max(128, _round_up(min(block_n, _round_up(N, 128)), 128))
    while _vmem_bytes_estimate(tn, F, L, D, C) * 2 > vmem_budget and tn > 256:
        tn = max(128, _round_up(tn // 2, 128))

    # --- bucketed tile count + reduction split over cores ----------------------
    n_tiles = pl.cdiv(N, tn)
    n_splits = n_splits if n_tiles >= 2 else 1
    n_tiles_b = max(pl.next_power_of_2(n_tiles), n_splits)    # bucket -> few distinct compiles
    tiles_per_split = n_tiles_b // n_splits
    n_pad = n_tiles_b * tn

    # pad + bf16 cast fused into one XLA op; halves the per-tile HBM stream of h.
    h_b = jnp.pad(h, ((0, n_pad - N), (0, 0))).astype(jnp.bfloat16)
    n_valid = jnp.array([N], dtype=jnp.int32)

    kernel = functools.partial(_attention_mb_kernel, d_attn=D,
                               tiles_per_split=tiles_per_split)

    resident = lambda *_: (0, 0)      # weights/biases: same block every grid step
    grid_spec = pltpu.PrefetchScalarGridSpec(
        num_scalar_prefetch=1,
        grid=(n_splits, tiles_per_split),
        in_specs=[
            pl.BlockSpec((tn, F), lambda i, j, *_: (i * tiles_per_split + j, 0)),  # h streamed
            pl.BlockSpec((F, L), resident),
            pl.BlockSpec((1, L), resident),
            pl.BlockSpec((L, 2 * D), resident),
            pl.BlockSpec((1, 2 * D), resident),
            pl.BlockSpec((C, D), resident),
            pl.BlockSpec((C, 1), resident),
        ],
        out_specs=(
            pl.BlockSpec((1, C, 1), lambda i, j, *_: (i, 0, 0)),                  # partial m
            pl.BlockSpec((1, C, 1), lambda i, j, *_: (i, 0, 0)),                  # partial l
            pl.BlockSpec((1, C, L), lambda i, j, *_: (i, 0, 0)),                  # partial acc
            pl.BlockSpec((C, tn), lambda i, j, *_: (0, i * tiles_per_split + j)), # A_raw tiles
        ),
        scratch_shapes=[
            pltpu.VMEM((C, 1), jnp.float32),    # running max
            pltpu.VMEM((C, 1), jnp.float32),    # running softmax denominator
            pltpu.VMEM((C, L), jnp.float32),    # running (rescaled) M accumulator
        ],
    )
    out_shapes = (
        jax.ShapeDtypeStruct((n_splits, C, 1), jnp.float32),
        jax.ShapeDtypeStruct((n_splits, C, 1), jnp.float32),
        jax.ShapeDtypeStruct((n_splits, C, L), jnp.float32),
        jax.ShapeDtypeStruct((C, n_pad), jnp.float32),
    )

    est = _vmem_bytes_estimate(tn, F, L, D, C)
    vmem_limit = int(min(max(2 * est, 32 * 1024 * 1024), vmem_budget))

    cost = pl.CostEstimate(
        flops=2 * n_pad * (F * L + L * 2 * D + D * C + C * L),
        transcendentals=n_pad * (2 * D + C),
        bytes_accessed=(2 * n_pad * F + 4 * C * n_pad
                        + 2 * (F * L + L * 2 * D)
                        + 4 * (C * D + L + 2 * D + C)
                        + 4 * n_splits * C * (2 + L)),
    )

    m_p, l_p, acc_p, a_raw = pl.pallas_call(
        kernel,
        out_shape=out_shapes,
        grid_spec=grid_spec,
        compiler_params=pltpu.CompilerParams(
            dimension_semantics=("parallel", "arbitrary"),   # split parallel, N-tiles reduce
            vmem_limit_bytes=vmem_limit),
        cost_estimate=cost,
    )(n_valid, h_b, prep["w_fc"], prep["b_fc"], prep["w_ab"], prep["b_ab"],
      prep["w_ct"], prep["b_c"])

    # --- tiny epilogue: combine per-split partials + per-class bag classifiers ---
    m_glob = jnp.max(m_p, axis=0)                         # (C, 1)
    scale = jnp.exp(m_p - m_glob)                         # (S, C, 1); fully-masked split -> 0
    l_glob = jnp.sum(scale * l_p, axis=0)                 # (C, 1)
    acc_glob = jnp.sum(scale * acc_p, axis=0)             # (C, L)
    M = acc_glob / l_glob                                 # (C, L) = softmax(A_raw) @ h1
    logits = jnp.sum(M * prep["w_cls"], axis=1, keepdims=True).T + prep["b_cls"]   # (1, C)
    y_prob = jax.nn.softmax(logits, axis=1)
    y_hat = jnp.argmax(logits, axis=1).reshape(1, 1).astype(jnp.int32)
    return logits, y_prob, y_hat, a_raw[:, :N]


# ---------------------------------------------------------------------------
# Parameter init (PyTorch xavier_normal_ + zero bias) and f32 reference
# ---------------------------------------------------------------------------
def _xavier_normal(key, fan_in, fan_out):
    std = (2.0 / (fan_in + fan_out)) ** 0.5
    # stored transposed: (in_features, out_features)
    return std * jax.random.normal(key, (fan_in, fan_out), dtype=jnp.float32)


def make_params(key, F, L, D, C):
    ks = jax.random.split(key, 5)
    return {
        "w_fc": _xavier_normal(ks[0], F, L), "b_fc": jnp.zeros((1, L), jnp.float32),
        "w_a": _xavier_normal(ks[1], L, D), "b_a": jnp.zeros((1, D), jnp.float32),
        "w_b": _xavier_normal(ks[2], L, D), "b_b": jnp.zeros((1, D), jnp.float32),
        "w_c": _xavier_normal(ks[3], D, C), "b_c": jnp.zeros((1, C), jnp.float32),
        # per-class Linear(L, 1) classifiers stacked -> (C, L) weights, (1, C) biases
        "w_cls": _xavier_normal(ks[4], L, C).T, "b_cls": jnp.zeros((1, C), jnp.float32),
    }


def _reference_forward(h, p):
    h1 = jnp.maximum(h @ p["w_fc"] + p["b_fc"], 0.0)
    a = jnp.tanh(h1 @ p["w_a"] + p["b_a"])
    b = jax.nn.sigmoid(h1 @ p["w_b"] + p["b_b"])
    A = ((a * b) @ p["w_c"] + p["b_c"]).T
    A_raw = A
    A_sm = jax.nn.softmax(A, axis=1)
    M = A_sm @ h1
    logits = (jnp.sum(M * p["w_cls"], axis=1, keepdims=True).T + p["b_cls"])
    return logits, jax.nn.softmax(logits, axis=1), jnp.argmax(logits, axis=1).reshape(1, 1), A_raw


if __name__ == "__main__":
    # Small shapes consistent with the module (a bag of N instances with F features).
    # N=300 with block_n=128 exercises: multi-tile streaming, the 2-way reduction split,
    # bucketed padding (n_pad=512), the partial-combine epilogue and the tail padding mask.
    N, F, L, D, C = 300, 32, 64, 32, 4

    key = jax.random.PRNGKey(0)
    k_h, k_p = jax.random.split(key)
    h = jax.random.normal(k_h, (N, F), dtype=jnp.float32)
    params = make_params(k_p, F, L, D, C)
    prep = prepare_params(params)     # one-time weight prep (concat / transpose / bf16 cast)

    logits, y_prob, y_hat, a_raw = jax.block_until_ready(
        attention_mb_forward(h, prep, block_n=128))
    print(logits)  # mirrors `print(logits)` in the PyTorch forward

    # sanity check against a pure-f32 JAX reference (bf16 MXU operands => loose tolerance)
    r_logits, r_prob, r_yhat, r_araw = _reference_forward(h, params)
    assert jnp.allclose(logits, r_logits, atol=3e-2, rtol=3e-2)
    assert jnp.allclose(y_prob, r_prob, atol=3e-2, rtol=3e-2)
    assert jnp.allclose(a_raw, r_araw, atol=3e-2, rtol=3e-2)
    srt = jnp.sort(r_logits[0])
    if float(srt[-1] - srt[-2]) > 0.05:   # only check argmax when unambiguous under bf16 error
        assert int(y_hat[0, 0]) == int(r_yhat[0, 0])

    print("KERNEL_OK")
</pallas_src>

<mosaic_0001>
module attributes {stable_mosaic.version = 11 : i64} {
  func.func @_attention_mb_kernel(%arg0: i32, %arg1: i32, %arg2: memref<1xi32, #tpu.memory_space<smem>>, %arg3: memref<128x32xbf16, #tpu.memory_space<vmem>>, %arg4: memref<32x64xbf16, #tpu.memory_space<vmem>>, %arg5: memref<1x64xf32, #tpu.memory_space<vmem>>, %arg6: memref<64x64xbf16, #tpu.memory_space<vmem>>, %arg7: memref<1x64xf32, #tpu.memory_space<vmem>>, %arg8: memref<4x32xf32, #tpu.memory_space<vmem>>, %arg9: memref<4x1xf32, #tpu.memory_space<vmem>>, %arg10: memref<1x4x1xf32, #tpu.memory_space<vmem>>, %arg11: memref<1x4x1xf32, #tpu.memory_space<vmem>>, %arg12: memref<1x4x64xf32, #tpu.memory_space<vmem>>, %arg13: memref<4x128xf32, #tpu.memory_space<vmem>>, %arg14: memref<4x1xf32, #tpu.memory_space<vmem>>, %arg15: memref<4x1xf32, #tpu.memory_space<vmem>>, %arg16: memref<4x64xf32, #tpu.memory_space<vmem>>) attributes {dimension_semantics = [#tpu.dimension_semantics<parallel>, #tpu.dimension_semantics<arbitrary>], iteration_bounds = array<i64: 2, 2>, scalar_prefetch = 1 : i64, scratch_operands = 3 : i64, tpu.core_type = #tpu.core_type<tc>, window_params = [{transform_indices = @transform_0, window_bounds = array<i64: 128, 32>}, {pipeline_mode = #tpu.pipeline_mode<synchronous>, transform_indices = @transform_1, window_bounds = array<i64: 32, 64>}, {pipeline_mode = #tpu.pipeline_mode<synchronous>, transform_indices = @transform_2, window_bounds = array<i64: 1, 64>}, {pipeline_mode = #tpu.pipeline_mode<synchronous>, transform_indices = @transform_3, window_bounds = array<i64: 64, 64>}, {pipeline_mode = #tpu.pipeline_mode<synchronous>, transform_indices = @transform_4, window_bounds = array<i64: 1, 64>}, {pipeline_mode = #tpu.pipeline_mode<synchronous>, transform_indices = @transform_5, window_bounds = array<i64: 4, 32>}, {pipeline_mode = #tpu.pipeline_mode<synchronous>, transform_indices = @transform_6, window_bounds = array<i64: 4, 1>}, {transform_indices = @transform_7, window_bounds = array<i64: 1, 4, 1>}, {transform_indices = @transform_8, window_bounds = array<i64: 1, 4, 1>}, {transform_indices = @transform_9, window_bounds = array<i64: 1, 4, 64>}, {transform_indices = @transform_10, window_bounds = array<i64: 4, 128>}]} {
    %c0 = arith.constant 0 : index
    %0 = memref.load %arg2[%c0] : memref<1xi32, #tpu.memory_space<smem>>
    %c0_i32 = arith.constant 0 : i32
    %1 = arith.cmpi eq, %arg1, %c0_i32 : i32
    %2 = arith.extui %1 : i1 to i32
    %c0_i32_0 = arith.constant 0 : i32
    %3 = arith.cmpi ne, %2, %c0_i32_0 : i32
    scf.if %3 {
      %cst_40 = arith.constant 0xFF800000 : f32
      %74 = vector.broadcast %cst_40 : f32 to vector<4x1xf32>
      %c0_41 = arith.constant 0 : index
      %c0_42 = arith.constant 0 : index
      %75 = vector.load %arg14[%c0_41, %c0_42] : memref<4x1xf32, #tpu.memory_space<vmem>>, vector<4x1xf32>
      tpu.vector_store %arg14[%c0_41, %c0_42], %74 {strides = array<i32>} : memref<4x1xf32, #tpu.memory_space<vmem>>, vector<4x1xf32>,
      %cst_43 = arith.constant 0.000000e+00 : f32
      %76 = vector.broadcast %cst_43 : f32 to vector<4x1xf32>
      %c0_44 = arith.constant 0 : index
      %c0_45 = arith.constant 0 : index
      %77 = vector.load %arg15[%c0_44, %c0_45] : memref<4x1xf32, #tpu.memory_space<vmem>>, vector<4x1xf32>
      tpu.vector_store %arg15[%c0_44, %c0_45], %76 {strides = array<i32>} : memref<4x1xf32, #tpu.memory_space<vmem>>, vector<4x1xf32>,
      %cst_46 = arith.constant 0.000000e+00 : f32
      %78 = vector.broadcast %cst_46 : f32 to vector<4x64xf32>
      %c0_47 = arith.constant 0 : index
      %c0_48 = arith.constant 0 : index
      %79 = vector.load %arg16[%c0_47, %c0_48] : memref<4x64xf32, #tpu.memory_space<vmem>>, vector<4x64xf32>
      tpu.vector_store %arg16[%c0_47, %c0_48], %78 {strides = array<i32>} : memref<4x64xf32, #tpu.memory_space<vmem>>, vector<4x64xf32>,
    } else {
    }
    %c0_1 = arith.constant 0 : index
    %c0_2 = arith.constant 0 : index
    %4 = vector.load %arg3[%c0_1, %c0_2] : memref<128x32xbf16, #tpu.memory_space<vmem>>, vector<128x32xbf16>
    %c0_3 = arith.constant 0 : index
    %c0_4 = arith.constant 0 : index
    %5 = vector.load %arg4[%c0_3, %c0_4] : memref<32x64xbf16, #tpu.memory_space<vmem>>, vector<32x64xbf16>
    %cst = arith.constant dense<0.000000e+00> : vector<128x64xf32>
    %6 = tpu.matmul %4, %5, %cst {dimension_numbers = #tpu.dot_dimension_numbers<[1], [0], [0], [1], [0, 0, 1, 1], [], []>} : vector<128x32xbf16>, vector<32x64xbf16>, vector<128x64xf32> -> vector<128x64xf32>
    %c0_5 = arith.constant 0 : index
    %c0_6 = arith.constant 0 : index
    %7 = vector.load %arg5[%c0_5, %c0_6] : memref<1x64xf32, #tpu.memory_space<vmem>>, vector<1x64xf32>
    %8 = vector.broadcast %7 : vector<1x64xf32> to vector<128x64xf32>
    %9 = arith.addf %6, %8 : vector<128x64xf32>
    %cst_7 = arith.constant 0.000000e+00 : f32
    %10 = vector.broadcast %cst_7 : f32 to vector<128x64xf32>
    %11 = arith.maximumf %9, %10 : vector<128x64xf32>
    %12 = arith.truncf %11 : vector<128x64xf32> to vector<128x64xbf16>
    %c0_8 = arith.constant 0 : index
    %c0_9 = arith.constant 0 : index
    %13 = vector.load %arg6[%c0_8, %c0_9] : memref<64x64xbf16, #tpu.memory_space<vmem>>, vector<64x64xbf16>
    %cst_10 = arith.constant dense<0.000000e+00> : vector<128x64xf32>
    %14 = tpu.matmul %12, %13, %cst_10 {dimension_numbers = #tpu.dot_dimension_numbers<[1], [0], [0], [1], [0, 0, 1, 1], [], []>} : vector<128x64xbf16>, vector<64x64xbf16>, vector<128x64xf32> -> vector<128x64xf32>
    %c0_11 = arith.constant 0 : index
    %c0_12 = arith.constant 0 : index
    %15 = vector.load %arg7[%c0_11, %c0_12] : memref<1x64xf32, #tpu.memory_space<vmem>>, vector<1x64xf32>
    %16 = vector.broadcast %15 : vector<1x64xf32> to vector<128x64xf32>
    %17 = arith.addf %14, %16 : vector<128x64xf32>
    %18 = vector.extract_strided_slice %17 {offsets = [0, 0], sizes = [128, 32], strides = [1, 1]} : vector<128x64xf32> to vector<128x32xf32>
    %19 = math.tanh %18 : vector<128x32xf32>
    %20 = vector.extract_strided_slice %17 {offsets = [0, 32], sizes = [128, 32], strides = [1, 1]} : vector<128x64xf32> to vector<128x32xf32>
    %21 = arith.negf %20 : vector<128x32xf32>
    %22 = math.exp %21 : vector<128x32xf32>
    %cst_13 = arith.constant 1.000000e+00 : f32
    %23 = vector.broadcast %cst_13 : f32 to vector<128x32xf32>
    %24 = arith.addf %23, %22 : vector<128x32xf32>
    %25 = arith.divf %23, %24 : vector<128x32xf32>
    %26 = arith.mulf %19, %25 : vector<128x32xf32>
    %c0_14 = arith.constant 0 : index
    %c0_15 = arith.constant 0 : index
    %27 = vector.load %arg8[%c0_14, %c0_15] : memref<4x32xf32, #tpu.memory_space<vmem>>, vector<4x32xf32>
    %cst_16 = arith.constant dense<0.000000e+00> : vector<4x128xf32>
    %28 = tpu.matmul %27, %26, %cst_16 {dimension_numbers = #tpu.dot_dimension_numbers<[1], [1], [0], [0], [0, 0, 1, 0], [], []>} : vector<4x32xf32>, vector<128x32xf32>, vector<4x128xf32> -> vector<4x128xf32>
    %c0_17 = arith.constant 0 : index
    %c0_18 = arith.constant 0 : index
    %29 = vector.load %arg9[%c0_17, %c0_18] : memref<4x1xf32, #tpu.memory_space<vmem>>, vector<4x1xf32>
    %30 = vector.broadcast %29 : vector<4x1xf32> to vector<4x128xf32>
    %31 = arith.addf %28, %30 : vector<4x128xf32>
    %c0_19 = arith.constant 0 : index
    %c0_20 = arith.constant 0 : index
    %32 = vector.load %arg13[%c0_19, %c0_20] : memref<4x128xf32, #tpu.memory_space<vmem>>, vector<4x128xf32>
    tpu.vector_store %arg13[%c0_19, %c0_20], %31 {strides = array<i32>} : memref<4x128xf32, #tpu.memory_space<vmem>>, vector<4x128xf32>,
    %c2_i32 = arith.constant 2 : i32
    %33 = arith.muli %arg0, %c2_i32 : i32
    %34 = arith.addi %33, %arg1 : i32
    %c128_i32 = arith.constant 128 : i32
    %35 = arith.muli %34, %c128_i32 : i32
    %36 = tpu.iota {dimensions = array<i32: 1>} : vector<1x128xi32>
    %37 = vector.broadcast %35 : i32 to vector<1x128xi32>
    %38 = arith.addi %37, %36 : vector<1x128xi32>
    %39 = vector.broadcast %0 : i32 to vector<1x128xi32>
    %40 = arith.cmpi slt, %38, %39 : vector<1x128xi32>
    %cst_21 = arith.constant 0xFF800000 : f32
    %41 = vector.shape_cast %40 : vector<1x128xi1> to vector<1x128xi1>
    %42 = vector.broadcast %41 : vector<1x128xi1> to vector<4x128xi1>
    %43 = vector.broadcast %cst_21 : f32 to vector<4x128xf32>
    %44 = arith.select %42, %31, %43 : vector<4x128xi1>, vector<4x128xf32>
    %c0_22 = arith.constant 0 : index
    %c0_23 = arith.constant 0 : index
    %45 = vector.load %arg14[%c0_22, %c0_23] : memref<4x1xf32, #tpu.memory_space<vmem>>, vector<4x1xf32>
    %cst_24 = arith.constant dense<0xFF800000> : vector<4xf32>
    %46 = vector.multi_reduction <maximumf>, %44, %cst_24 [1] : vector<4x128xf32> to vector<4xf32>
    %47 = vector.shape_cast %46 : vector<4xf32> to vector<4x1xf32>
    %48 = arith.maximumf %45, %47 : vector<4x1xf32>
    %cst_25 = arith.constant 0xFF800000 : f32
    %49 = vector.broadcast %cst_25 : f32 to vector<4x1xf32>
    %50 = arith.cmpf oeq, %48, %49 : vector<4x1xf32>
    %cst_26 = arith.constant 0.000000e+00 : f32
    %51 = vector.broadcast %cst_26 : f32 to vector<4x1xf32>
    %52 = arith.select %50, %51, %48 : vector<4x1xi1>, vector<4x1xf32>
    %53 = arith.subf %45, %52 : vector<4x1xf32>
    %54 = math.exp %53 : vector<4x1xf32>
    %55 = vector.broadcast %52 : vector<4x1xf32> to vector<4x128xf32>
    %56 = arith.subf %44, %55 : vector<4x128xf32>
    %57 = math.exp %56 : vector<4x128xf32>
    %c0_27 = arith.constant 0 : index
    %c0_28 = arith.constant 0 : index
    %58 = vector.load %arg15[%c0_27, %c0_28] : memref<4x1xf32, #tpu.memory_space<vmem>>, vector<4x1xf32>
    %59 = arith.mulf %54, %58 : vector<4x1xf32>
    %cst_29 = arith.constant dense<0.000000e+00> : vector<4xf32>
    %60 = vector.multi_reduction <add>, %57, %cst_29 [1] : vector<4x128xf32> to vector<4xf32>
    %61 = vector.shape_cast %60 : vector<4xf32> to vector<4x1xf32>
    %62 = arith.addf %59, %61 : vector<4x1xf32>
    %c0_30 = arith.constant 0 : index
    %c0_31 = arith.constant 0 : index
    %63 = vector.load %arg15[%c0_30, %c0_31] : memref<4x1xf32, #tpu.memory_space<vmem>>, vector<4x1xf32>
    tpu.vector_store %arg15[%c0_30, %c0_31], %62 {strides = array<i32>} : memref<4x1xf32, #tpu.memory_space<vmem>>, vector<4x1xf32>,
    %c0_32 = arith.constant 0 : index
    %c0_33 = arith.constant 0 : index
    %64 = vector.load %arg16[%c0_32, %c0_33] : memref<4x64xf32, #tpu.memory_space<vmem>>, vector<4x64xf32>
    %65 = vector.broadcast %54 : vector<4x1xf32> to vector<4x64xf32>
    %66 = arith.mulf %65, %64 : vector<4x64xf32>
    %cst_34 = arith.constant dense<0.000000e+00> : vector<4x64xf32>
    %67 = tpu.matmul %57, %11, %cst_34 {dimension_numbers = #tpu.dot_dimension_numbers<[1], [0], [0], [1], [0, 0, 1, 1], [], []>} : vector<4x128xf32>, vector<128x64xf32>, vector<4x64xf32> -> vector<4x64xf32>
    %68 = arith.addf %66, %67 : vector<4x64xf32>
    %c0_35 = arith.constant 0 : index
    %c0_36 = arith.constant 0 : index
    %69 = vector.load %arg16[%c0_35, %c0_36] : memref<4x64xf32, #tpu.memory_space<vmem>>, vector<4x64xf32>
    tpu.vector_store %arg16[%c0_35, %c0_36], %68 {strides = array<i32>} : memref<4x64xf32, #tpu.memory_space<vmem>>, vector<4x64xf32>,
    %c0_37 = arith.constant 0 : index
    %c0_38 = arith.constant 0 : index
    %70 = vector.load %arg14[%c0_37, %c0_38] : memref<4x1xf32, #tpu.memory_space<vmem>>, vector<4x1xf32>
    tpu.vector_store %arg14[%c0_37, %c0_38], %48 {strides = array<i32>} : memref<4x1xf32, #tpu.memory_space<vmem>>, vector<4x1xf32>,
    %c1_i32 = arith.constant 1 : i32
    %71 = arith.cmpi eq, %arg1, %c1_i32 : i32
    %72 = arith.extui %71 : i1 to i32
    %c0_i32_39 = arith.constant 0 : i32
    %73 = arith.cmpi ne, %72, %c0_i32_39 : i32
    scf.if %73 {
      %c0_40 = arith.constant 0 : index
      %c0_41 = arith.constant 0 : index
      %74 = vector.load %arg14[%c0_40, %c0_41] : memref<4x1xf32, #tpu.memory_space<vmem>>, vector<4x1xf32>
      %75 = vector.shape_cast %74 : vector<4x1xf32> to vector<1x4x1xf32>
      %c0_42 = arith.constant 0 : index
      %c0_43 = arith.constant 0 : index
      %c0_44 = arith.constant 0 : index
      %76 = vector.load %arg10[%c0_42, %c0_43, %c0_44] : memref<1x4x1xf32, #tpu.memory_space<vmem>>, vector<1x4x1xf32>
      tpu.vector_store %arg10[%c0_42, %c0_43, %c0_44], %75 {strides = array<i32>} : memref<1x4x1xf32, #tpu.memory_space<vmem>>, vector<1x4x1xf32>,
      %c0_45 = arith.constant 0 : index
      %c0_46 = arith.constant 0 : index
      %77 = vector.load %arg15[%c0_45, %c0_46] : memref<4x1xf32, #tpu.memory_space<vmem>>, vector<4x1xf32>
      %78 = vector.shape_cast %77 : vector<4x1xf32> to vector<1x4x1xf32>
      %c0_47 = arith.constant 0 : index
      %c0_48 = arith.constant 0 : index
      %c0_49 = arith.constant 0 : index
      %79 = vector.load %arg11[%c0_47, %c0_48, %c0_49] : memref<1x4x1xf32, #tpu.memory_space<vmem>>, vector<1x4x1xf32>
      tpu.vector_store %arg11[%c0_47, %c0_48, %c0_49], %78 {strides = array<i32>} : memref<1x4x1xf32, #tpu.memory_space<vmem>>, vector<1x4x1xf32>,
      %c0_50 = arith.constant 0 : index
      %c0_51 = arith.constant 0 : index
      %80 = vector.load %arg16[%c0_50, %c0_51] : memref<4x64xf32, #tpu.memory_space<vmem>>, vector<4x64xf32>
      %81 = vector.shape_cast %80 : vector<4x64xf32> to vector<1x4x64xf32>
      %c0_52 = arith.constant 0 : index
      %c0_53 = arith.constant 0 : index
      %c0_54 = arith.constant 0 : index
      %82 = vector.load %arg12[%c0_52, %c0_53, %c0_54] : memref<1x4x64xf32, #tpu.memory_space<vmem>>, vector<1x4x64xf32>
      tpu.vector_store %arg12[%c0_52, %c0_53, %c0_54], %81 {strides = array<i32>} : memref<1x4x64xf32, #tpu.memory_space<vmem>>, vector<1x4x64xf32>,
    } else {
    }
    return
  }
  func.func @transform_0(%arg0: i32, %arg1: i32, %arg2: memref<1xi32, #tpu.memory_space<smem>>) -> (i32, i32) {
    %c2_i32 = arith.constant 2 : i32
    %0 = arith.muli %arg0, %c2_i32 : i32
    %1 = arith.addi %0, %arg1 : i32
    %c0_i32 = arith.constant 0 : i32
    %c0_i32_0 = arith.constant 0 : i32
    return %1, %c0_i32 : i32, i32
  }
  func.func @transform_1(%arg0: i32, %arg1: i32, %arg2: memref<1xi32, #tpu.memory_space<smem>>) -> (i32, i32) {
    %c0_i32 = arith.constant 0 : i32
    %c0_i32_0 = arith.constant 0 : i32
    %c0_i32_1 = arith.constant 0 : i32
    return %c0_i32, %c0_i32_0 : i32, i32
  }
  func.func @transform_2(%arg0: i32, %arg1: i32, %arg2: memref<1xi32, #tpu.memory_space<smem>>) -> (i32, i32) {
    %c0_i32 = arith.constant 0 : i32
    %c0_i32_0 = arith.constant 0 : i32
    %c0_i32_1 = arith.constant 0 : i32
    return %c0_i32, %c0_i32_0 : i32, i32
  }
  func.func @transform_3(%arg0: i32, %arg1: i32, %arg2: memref<1xi32, #tpu.memory_space<smem>>) -> (i32, i32) {
    %c0_i32 = arith.constant 0 : i32
    %c0_i32_0 = arith.constant 0 : i32
    %c0_i32_1 = arith.constant 0 : i32
    return %c0_i32, %c0_i32_0 : i32, i32
  }
  func.func @transform_4(%arg0: i32, %arg1: i32, %arg2: memref<1xi32, #tpu.memory_space<smem>>) -> (i32, i32) {
    %c0_i32 = arith.constant 0 : i32
    %c0_i32_0 = arith.constant 0 : i32
    %c0_i32_1 = arith.constant 0 : i32
    return %c0_i32, %c0_i32_0 : i32, i32
  }
  func.func @transform_5(%arg0: i32, %arg1: i32, %arg2: memref<1xi32, #tpu.memory_space<smem>>) -> (i32, i32) {
    %c0_i32 = arith.constant 0 : i32
    %c0_i32_0 = arith.constant 0 : i32
    %c0_i32_1 = arith.constant 0 : i32
    return %c0_i32, %c0_i32_0 : i32, i32
  }
  func.func @transform_6(%arg0: i32, %arg1: i32, %arg2: memref<1xi32, #tpu.memory_space<smem>>) -> (i32, i32) {
    %c0_i32 = arith.constant 0 : i32
    %c0_i32_0 = arith.constant 0 : i32
    %c0_i32_1 = arith.constant 0 : i32
    return %c0_i32, %c0_i32_0 : i32, i32
  }
  func.func @transform_7(%arg0: i32, %arg1: i32, %arg2: memref<1xi32, #tpu.memory_space<smem>>) -> (i32, i32, i32) {
    %c0_i32 = arith.constant 0 : i32
    %c0_i32_0 = arith.constant 0 : i32
    %c0_i32_1 = arith.constant 0 : i32
    return %arg0, %c0_i32, %c0_i32_0 : i32, i32, i32
  }
  func.func @transform_8(%arg0: i32, %arg1: i32, %arg2: memref<1xi32, #tpu.memory_space<smem>>) -> (i32, i32, i32) {
    %c0_i32 = arith.constant 0 : i32
    %c0_i32_0 = arith.constant 0 : i32
    %c0_i32_1 = arith.constant 0 : i32
    return %arg0, %c0_i32, %c0_i32_0 : i32, i32, i32
  }
  func.func @transform_9(%arg0: i32, %arg1: i32, %arg2: memref<1xi32, #tpu.memory_space<smem>>) -> (i32, i32, i32) {
    %c0_i32 = arith.constant 0 : i32
    %c0_i32_0 = arith.constant 0 : i32
    %c0_i32_1 = arith.constant 0 : i32
    return %arg0, %c0_i32, %c0_i32_0 : i32, i32, i32
  }
  func.func @transform_10(%arg0: i32, %arg1: i32, %arg2: memref<1xi32, #tpu.memory_space<smem>>) -> (i32, i32) {
    %c2_i32 = arith.constant 2 : i32
    %0 = arith.muli %arg0, %c2_i32 : i32
    %1 = arith.addi %0, %arg1 : i32
    %c0_i32 = arith.constant 0 : i32
    %c0_i32_0 = arith.constant 0 : i32
    return %c0_i32, %1 : i32, i32
  }
}

</mosaic_0001>

<bundles_post_ra>
// kernel: tpu_custom_call.1
= control target key start
LH: loop header
LB: loop body
LE: loop exit
PB: predicated region body
PF: predicated region fallthrough
CT: control target
= control target key end

     0   :  { %s2713_s0 = inlined_call_operand.<no memory space> [shape: s32[1], index: 0, kind: input, shape index: {}]   ;;  %s2714_s1 = inlined_call_operand.vmem [shape: bf16[512,32], index: 1, kind: input, shape index: {}]   ;;  %s2715_s2 = inlined_call_operand.vmem [shape: bf16[32,64], index: 2, kind: input, shape index: {}]   ;;  %s2716_s3 = inlined_call_operand.vmem [shape: f32[1,64], index: 3, kind: input, shape index: {}]   ;;  %s2717_s4 = inlined_call_operand.vmem [shape: bf16[64,64], index: 4, kind: input, shape index: {}]   ;;  %s2718_s5 = inlined_call_operand.vmem [shape: f32[1,64], index: 5, kind: input, shape index: {}]   ;;  %s2719_s6 = inlined_call_operand.vmem [shape: f32[4,32], index: 6, kind: input, shape index: {}]   ;;  %s2720_s7 = inlined_call_operand.vmem [shape: f32[4,1], index: 7, kind: input, shape index: {}]   ;;  %s2721_s8 = inlined_call_operand.vmem [shape: f32[2,4,1], index: 8, kind: output, shape index: {0}]   ;;  %s2722_s9 = inlined_call_operand.vmem [shape: f32[2,4,1], index: 9, kind: output, shape index: {1}]   ;;  %s2723_s10 = inlined_call_operand.hbm [shape: f32[2,4,64], index: 10, kind: output, shape index: {2}]   ;;  %s2724_s11 = inlined_call_operand.hbm [shape: f32[4,512], index: 11, kind: output, shape index: {3}]  }
   0x1   :  { %2740 = sst [smem:[#allocation25_spill]] %s2716_s3 }
   0x2   :  { %2741 = sst [smem:[#allocation26_spill]] %s2718_s5 }
   0x3   :  { %2742 = sst [smem:[#allocation27_spill]] %s2719_s6 }
   0x4   :  { %2743 = sst [smem:[#allocation28_spill]] %s2720_s7 }
   0x5   :  { %2744 = sst [smem:[#allocation29_spill]] %s2723_s10 }
   0x6   :  { %2745 = sst [smem:[#allocation30_spill]] %s2724_s11 }
   0x7   :  { %17 = sst [smem:[#allocation6]] %s2713_s0 }
   0x8   :  { %18 = vsyncpa [#allocation8], 0 }
   0x9   :  { %20 = vsyncpa [#allocation8 + $0x1], 0 }
   0xa   :  { %21 = vsyncpa [#allocation10], 0 }
   0xb   :  { %23 = vsyncpa [#allocation10 + $0x1], 0  ;;  %s2238_s19 = smov 0   ;;  %s2240_s20 = smov 0  }
   0xc   :  { %s2242_s21 = smov 0   ;;  %s2244_s22 = smov 0  }
   0xd   :  { %s2246_s23 = smov 0   ;;  %s2248_s24 = smov 0  }
   0xe   :  { %s2250_s25 = smov 0   ;;  %s2252_s26 = smov 0  }
   0xf   :  { %s2254_s0 = smov 0   ;;  %s2256_s27 = smov 0  }
  0x10   :  { %s2258_s28 = smov 0  }
  0x11 LB: > { %2746 = sst [smem:[#allocation13_spill]] %s2124_s19  ;;  %s1473_s29 = sadd.s32 4294967295, %s2164_s28   ;;  %s2164_s28 = sphi %s2258_s28, %s29_s28   ;;  %s2160_s27 = sphi %s2256_s27, %s2786_s27   ;;  %s2156_s0 = sphi %s2254_s0, %s2785_s0   ;;  %s2152_s26 = sphi %s2252_s26, %s2784_s26   ;;  %s2148_s25 = sphi %s2250_s25, %s2783_s25   ;;  %s2144_s24 = sphi %s2248_s24, %s2782_s24   ;;  %s2140_s23 = sphi %s2246_s23, %s2790_s23   ;;  %s2136_s22 = sphi %s2244_s22, %s2789_s22   ;;  %s2132_s21 = sphi %s2242_s21, %s2780_s21   ;;  %s2128_s20 = sphi %s2240_s20, %s2788_s20   ;;  %s2124_s19 = sphi %s2238_s19, %s2787_s19  }
  0x12   : > { %2747 = sst [smem:[#allocation14_spill]] %s2132_s21  ;;  %s1474_s30 = sadd.s32 4294967294, %s2164_s28  }
  0x13   : > { %2748 = sst [smem:[#allocation15_spill]] %s2136_s22  ;;  %s38_s12 = sadd.s32 1, %s2156_s0 }
  0x14   : > { %2749 = sst [smem:[#allocation16_spill]] %s2144_s24  ;;  %s41_s13 = sadd.s32 1, %s2160_s27 }
  0x15   : > { %2750 = sst [smem:[#allocation17_spill]] %s2156_s0  ;;  %p39_p0 = scmp.ge.s32.totalorder %s38_s12, 2 }
  0x16   : > { %2751 = sst [smem:[#allocation18_spill]] %s2160_s27  ;;  %s256_s14 = sadd.s32 1, %s2144_s24 }
  0x17   : > { %p266_p1 = scmp.ne.s32.totalorder %s2144_s24, %s2140_s23  ;;  %p2300_p2 = scmp.eq.s32.totalorder %s1473_s29, 3 }
  0x18   : > { %s2792_s12 = smov (%p39_p0, %s38_s12), 0  ;;  %s2794_s13 = smov (!%p39_p0, %s41_s13), %s2160_s27 }
  0x19   : > { %2753 = sst [smem:[#allocation19_spill]] %s2792_s12  ;;  %p2309_p3 = por %p2300_p2, %p266_p1 }
  0x1a   : > { %p272_p4 = scmp.ne.s32.totalorder %s2140_s23, %s2136_s22  ;;  %p43_p5 = scmp.ge.s32.totalorder %s2794_s13, 2 }
  0x1b   : > { %s2754_s16 = scalar_select %p2309_p3, 1, 0 }
  0x1c   : > { %p2315_p6 = scmp.eq.s32.totalorder %s1474_s30, 3  ;;  %s1477_s18 = sshll.u32 %s2160_s27, 1 }
  0x1d   : > { %2755 = sst [smem:[#allocation20_spill]] %s2754_s16  ;;  %s286_s29 = sadd.s32 1, %s2132_s21 }
  0x1e   : > { %s2796_s13 = smov (%p43_p5, %s2794_s13), 0  ;;  %p2325_p7 = por %p2315_p6, %p272_p4 }
  0x1f   : > { %2757 = sst [smem:[#allocation21_spill]] %s2796_s13  ;;  %s280_s30 = sadd.s32 %s2156_s0, %s1477_s18 }
  0x20   : > { %s253_s11 = ssub.s32 %s2160_s27, %s2796_s13  ;;  %s1478_s10 = sshll.u32 %s2796_s13, 1 }
  0x21   : > { %p254_p8 = scmp.eq.s32.totalorder %s253_s11, 0  ;;  %s282_s16 = sadd.s32 %s1478_s10, %s2792_s12 }
  0x22   : > { %s283_s6 = ssub.s32 %s280_s30, %s282_s16  ;;  %p296_p9 = scmp.ne.s32.totalorder %s2132_s21, %s2128_s20 }
  0x23   : > { %s2337_s7 = scalar_select %p254_p8, %s2144_s24, %s256_s14  }
  0x24   : > { %p284_p10 = scmp.eq.s32.totalorder %s283_s6, 0  ;;  %p2341_p11 = por %p296_p9, %p2300_p2 }
  0x25   : > { %2759 = sst [smem:[#allocation22_spill]] %s2337_s7  ;;  %p302_p12 = scmp.ne.s32.totalorder %s2128_s20, %s2124_s19 }
  0x26   : > { %p1481_p13 = scmp.ge.s32.totalorder %s2164_s28, 1  ;;  %p352_p1 = scmp.lt.s32.totalorder %s2164_s28, 5 }
  0x27   : > { %s2349_s3 = scalar_select %p284_p10, %s2132_s21, %s286_s29  }
  0x28   : > { %p2353_p0 = por %p302_p12, %p2315_p6  ;;  %p353_p4 = pnand %p1481_p13, %p352_p1 }
  0x29   : > { %2761 = sst [smem:[#allocation23_spill]] %s2349_s3  ;;  %s2732_s6 = sand.u32 (!%p353_p4), 1, %s2140_s23  }
  0x2a   : > { %s2762_s18 = scalar_select %p2353_p0, 1, 0 }
  0x2b   : > { %356 = sbr.rel (%p353_p4) target bundleno = 1495 (0x5d7), region = 48  ;;  %s2735_s10 = sand.u32 (!%p353_p4), 1, %s2128_s20  }
  0x2c   : > { %2763 = sst [smem:[#allocation24_spill]] %s2762_s18  ;;  %s2362_s11 = sshll.u32 (!%p353_p4), %s2732_s6, 2 }
  0x2d   : > { %s2366_s14 = sshll.u32 (!%p353_p4), %s2735_s10, 2  ;;  %s1484_s15 = sshll.u32 (!%p353_p4), %s2152_s26, 1 }
  0x2e   : > { %p415_p2 = scmp.lt.s32.totalorder (!%p353_p4), %s2152_s26, 1  ;;  %s2371_s16 = sadd.s32 (!%p353_p4), %s2148_s25, %s1484_s15 }
  0x2f   : > { %s2373_s17 = sld [smem:[#allocation6]] (!%p353_p4)  ;;  %s1485_s29 = sshll.u32 (!%p353_p4), %s2371_s16, 4 }
  0x30   : > { %p408_p5 = scmp.lt.s32.totalorder (!%p353_p4), %s1485_s29, 63  ;;  %s397_s18 = scalar_lea.vmem (!%p353_p4), [#allocation7], %s2362_s11 }
  0x31   : > { %s404_s19 = scalar_lea.vmem (!%p353_p4), [#allocation9], %s2366_s14  ;;  %p1489_p6 = scmp.ne.s32.totalorder (!%p353_p4), %s2148_s25, 0 }
  0x32   : > { %s416_s30 = scalar_select %p415_p2, %s2152_s26, 1 }
  0x33   : > { %s2798_s29 = smov (!%p408_p5, %s1485_s29), 63  ;;  %430 = sbr.rel (%p1489_p6) target bundleno = 58 (0x3a), region = 52 }
  0x34   : > { %s1487_s13 = sshll.u32 %s416_s30, 2  ;;  %s1486_s12 = sshll.u32 %s2798_s29, 2  ;;  %vm431_vm0 = vcmask (!%p1489_p6), 3072   ;;  %vm434_vm1 = vcmask (!%p1489_p6), 519168   ;;  %v2166_v0 = vmov (!%p1489_p6), -inf   ;;  %v2167_v1 = vmov (!%p1489_p6), 0.0  }
  0x35   : > { %s2380_s0 = scalar_lea.vmem %s2721_s8, %s1487_s13  ;;  %s2385_s24 = scalar_lea.vmem %s2714_s1, %s1486_s12  ;;  %432 = vst.msk [vmem:[#allocation2] sm:$0xf] (!%p1489_p6), %vm431_vm0, %v2166_v0  ;;  %433 = vst.msk [vmem:[#allocation3] sm:$0xf] (!%p1489_p6), %vm431_vm0, %v2167_v1 }
  0x36   : > { %s2390_s21 = scalar_lea.vmem %s2722_s9, %s1487_s13  ;;  %435 = vst.msk [vmem:[#allocation4] sm:$0xf] (!%p1489_p6), %vm434_vm1, %v2167_v1 }
  0x3a PF: > { %v1900_v2 = vld [vmem:[%s2715_s2] sm:$0xff]   ;;  %v1901_v3 = vld [vmem:[%s2715_s2 + $0x8] sm:$0xff]   ;;  %vm515_vm2 = vcmask 261120   ;;  %v1904_v6 = vld [vmem:[%s2385_s24 + $0x10] sm:$0xff]   ;;  %v2168_v16 = vmov 0.0|0.0   ;;  %s2764_s12 = sld [smem:[#allocation25_spill]] }
  0x3b   : > { %1621 = vmatprep.subr.bf16.mxu0 %v1900_v2  ;;  %v1902_v4 = vld [vmem:[%s2385_s24] sm:$0xff]   ;;  %v1903_v5 = vld [vmem:[%s2385_s24 + $0x8] sm:$0xff]   ;;  %v1905_v9 = vld [vmem:[%s2385_s24 + $0x18] sm:$0xff]   ;;  %vm700_vm3 = vcmask 523264   ;;  %s2765_s10 = sld [smem:[#allocation26_spill]]  ;;  %s2169_s29 = smov 96  }
  0x3c   : > { %1622 = vmatpush3.bf16.msra.mxu0 %v1900_v2  ;;  %1625 = vmatprep.mubr.msk.bf16.mxu0 %vm515_vm2, %v1902_v4  ;;  %v1910_v7 = vld [vmem:[%s2717_s4] sm:$0xff]   ;;  %v1911_v8 = vld [vmem:[%s2717_s4 + $0x8] sm:$0xff]   ;;  %v1908_v12 = vld [vmem:[%s2385_s24 + $0x30] sm:$0xff]   ;;  %vm2170_vm4 = vmmov 0   ;;  %s2766_s7 = sld [smem:[#allocation28_spill]]  ;;  %s2769_s3 = sld [smem:[#allocation27_spill]] }
  0x3d   : > { %1623 = vmatprep.subr.bf16.mxu0 %v1901_v3  ;;  %1641 = vmatprep.subr.bf16.mxu1 %v1910_v7  ;;  %v1906_v10 = vld [vmem:[%s2385_s24 + $0x20] sm:$0xff]   ;;  %v1907_v11 = vld [vmem:[%s2385_s24 + $0x28] sm:$0xff]   ;;  %v1909_v13 = vld [vmem:[%s2385_s24 + $0x38] sm:$0xff]   ;;  %vm1156_vm7 = vcmask 1043456   ;;  %vm1180_vm8 = vcmask 3072   ;;  %vm1260_vm10 = vcmask 519168  }
  0x3e   : > { %1642 = vmatpush3.bf16.msra.mxu1 %v1910_v7  ;;  %v1912_v14 = vld [vmem:[%s2717_s4 + $0x10] sm:$0xff]   ;;  %v1913_v15 = vld [vmem:[%s2717_s4 + $0x18] sm:$0xff]   ;;  %vm2563_vm5 = vmpackc.low %vm515_vm2, %vm515_vm2  ;;  %p1557_p8 = scmp.ne.s32.totalorder %s2148_s25, 1 }
  0x3f   : > { %1643 = vmatprep.subr.bf16.mxu1 %v1911_v8 }
  0x40   : > { %1624 = vmatpush3.bf16.msra.mxu0 %v1901_v3  ;;  %v2434_v17 = vld [vmem:[%s2764_s12] ss:$0 sm:$0xff]  ;;  %s1556_s12 = sshll.u32 %s2371_s16, 7 }
  0x41   : > { %1735 = vmatprep.subr.bf16.mxu0 %v2168_v16 }
  0x42   : > { %1644 = vmatpush3.bf16.msra.mxu1 %v1911_v8 }
  0x43   : > { %1626 = vmatmul.mubr.msk.bf16.vlgmr.msra.gmra.mrb[0].mxu0 %vm515_vm2, %v1903_v5  ;;  %1645 = vmatprep.subr.bf16.mxu1 %v1912_v14 }
  0x44   : > { %1629 = vmatprep.mubr.msk.bf16.mxu0 %vm515_vm2, %v1904_v6 }
  0x46   : > { %1646 = vmatpush3.bf16.msra.mxu1 %v1912_v14 }
  0x47   : > { %1647 = vmatprep.subr.bf16.mxu1 %v1913_v15 }
  0x4a   : > { %1648 = vmatpush3.bf16.msra.mxu1 %v1913_v15 }
  0x4b   : > { %1630 = vmatmul.mubr.msk.bf16.gmra.mrb[4].mxu0 %vm515_vm2, %v1905_v9  ;;  %1767 = vmatprep.subr.bf16.mxu1 %v2168_v16 }
  0x4c   : > { %1633 = vmatprep.mubr.msk.bf16.mxu0 %vm515_vm2, %v1906_v10  ;;  %v2470_v10 = vld [vmem:[%s2765_s10] ss:$0 sm:$0xff] }
  0x53   : > { %1634 = vmatmul.mubr.msk.bf16.gmra.mrb[8].mxu0 %vm515_vm2, %v1907_v11 }
  0x54   : > { %1637 = vmatprep.mubr.msk.bf16.mxu0 %vm515_vm2, %v1908_v12 }
  0x5b   : > { %1638 = vmatmul.mubr.msk.bf16.gmra.mrb[12].mxu0 %vm515_vm2, %v1909_v13 }
 0x116   : > { %v1627_v18 = vpop.f32.mrb[0].mxu0 }
 0x117   : > { %v583_v19 = vadd.f32 %v1627_v18, %v2434_v17  ;;  %v574_v20 = vpop.f32.mrb[1].mxu0 }
 0x118   : > { %v575_v21 = vadd.f32 %v2434_v17, %v574_v20  ;;  %v1628_v22 = vpop.f32.mrb[2].mxu0 }
 0x119   : > { %v586_v23 = vadd.f32 %v1628_v22, %v2434_v17  ;;  %v577_v24 = vpop.f32.mrb[3].mxu0  ;;  %v639_v26 = vmax.f32 %v583_v19, 0.0 }
 0x11a   : > { %v578_v25 = vadd.f32 %v2434_v17, %v577_v24  ;;  %v637_v28 = vmax.f32 %v575_v21, 0.0 }
 0x11b   : > { %v640_v27 = vmax.f32 %v586_v23, 0.0 }
 0x11c   : > { %v638_v29 = vmax.f32 %v578_v25, 0.0 }
 0x11d   : > { %v654_v30 = vpack.c.bf16 %v640_v27, %v639_v26 }
 0x11e   : > { %v1631_v31 = vpop.f32.mrb[4].mxu0  ;;  %v653_v32 = vpack.c.bf16 %v638_v29, %v637_v28 }
 0x11f   : > { %v599_v33 = vadd.f32 %v1631_v31, %v2434_v17  ;;  %v590_v34 = vpop.f32.mrb[5].mxu0 }
 0x120   : > { %v591_v35 = vadd.f32 %v2434_v17, %v590_v34  ;;  %v1632_v36 = vpop.f32.mrb[6].mxu0  ;;  %1649 = vmatprep.mubr.msk.bf16.mxu1 %vm700_vm3, %v653_v32 }
 0x121   : > { %v643_v37 = vmax.f32 %v599_v33, 0.0  ;;  %v602_v38 = vadd.f32 %v1632_v36, %v2434_v17  ;;  %v593_v39 = vpop.f32.mrb[7].mxu0  ;;  %1650 = vmatmul.mubr.msk.bf16.vlgmr.msra.gmra.mrb[0].mxu1 %vm700_vm3, %v654_v30 }
 0x122   : > { %v641_v40 = vmax.f32 %v591_v35, 0.0  ;;  %v594_v41 = vadd.f32 %v2434_v17, %v593_v39  ;;  %1769 = vmatpush3.bf16.msra.mxu1 %v653_v32 }
 0x123   : > { %v644_v42 = vmax.f32 %v602_v38, 0.0  ;;  %1770 = vmatprep.subr.bf16.mxu1 %v2168_v16 }
 0x124   : > { %v642_v43 = vmax.f32 %v594_v41, 0.0 }
 0x125   : > { %v656_v44 = vpack.c.bf16 %v644_v42, %v643_v37 }
 0x126   : > { %v655_v45 = vpack.c.bf16 %v642_v43, %v641_v40  ;;  %1772 = vmatpush3.bf16.msra.mxu1 %v654_v30  ;;  %v1635_v46 = vpop.f32.mrb[8].mxu0 }
 0x127   : > { %v615_v47 = vadd.f32 %v1635_v46, %v2434_v17  ;;  %v606_v48 = vpop.f32.mrb[9].mxu0  ;;  %1773 = vmatprep.subr.bf16.mxu1 %v2168_v16 }
 0x128   : > { %v607_v49 = vadd.f32 %v2434_v17, %v606_v48  ;;  %v1636_v50 = vpop.f32.mrb[10].mxu0  ;;  %1653 = vmatprep.mubr.msk.bf16.mxu1 %vm700_vm3, %v655_v45 }
 0x129   : > { %v647_v51 = vmax.f32 %v615_v47, 0.0  ;;  %v618_v52 = vadd.f32 %v1636_v50, %v2434_v17  ;;  %v609_v53 = vpop.f32.mrb[11].mxu0  ;;  %1654 = vmatmul.mubr.msk.bf16.gmra.mrb[4].mxu1 %vm700_vm3, %v656_v44 }
 0x12a   : > { %v645_v54 = vmax.f32 %v607_v49, 0.0  ;;  %v610_v55 = vadd.f32 %v2434_v17, %v609_v53  ;;  %1775 = vmatpush3.bf16.msra.mxu1 %v655_v45 }
 0x12b   : > { %v648_v56 = vmax.f32 %v618_v52, 0.0  ;;  %1776 = vmatprep.subr.bf16.mxu1 %v2168_v16 }
 0x12c   : > { %v646_v57 = vmax.f32 %v610_v55, 0.0 }
 0x12d   : > { %v658_v58 = vpack.c.bf16 %v648_v56, %v647_v51 }
 0x12e   : > { %v657_v59 = vpack.c.bf16 %v646_v57, %v645_v54  ;;  %v1639_v60 = vpop.f32.mrb[12].mxu0  ;;  %1778 = vmatpush3.bf16.msra.mxu1 %v656_v44 }
 0x12f   : > { %v631_v61 = vadd.f32 %v1639_v60, %v2434_v17  ;;  %v622_v62 = vpop.f32.mrb[13].mxu0  ;;  %1779 = vmatprep.subr.bf16.mxu1 %v2168_v16 }
 0x130   : > { %v623_v63 = vadd.f32 %v2434_v17, %v622_v62  ;;  %v1640_v0 = vpop.f32.mrb[14].mxu0  ;;  %1657 = vmatprep.mubr.msk.bf16.mxu1 %vm700_vm3, %v657_v59 }
 0x131   : > { %v651_v1 = vmax.f32 %v631_v61, 0.0  ;;  %v634_v2 = vadd.f32 %v1640_v0, %v2434_v17  ;;  %v625_v3 = vpop.f32.mrb[15].mxu0  ;;  %1658 = vmatmul.mubr.msk.bf16.gmra.mrb[8].mxu1 %vm700_vm3, %v658_v58 }
 0x132   : > { %v649_v4 = vmax.f32 %v623_v63, 0.0  ;;  %v626_v5 = vadd.f32 %v2434_v17, %v625_v3  ;;  %1781 = vmatpush3.bf16.msra.mxu1 %v657_v59 }
 0x133   : > { %v652_v6 = vmax.f32 %v634_v2, 0.0  ;;  %1782 = vmatprep.subr.bf16.mxu1 %v2168_v16 }
 0x134   : > { %v650_v7 = vmax.f32 %v626_v5, 0.0 }
 0x135   : > { %v660_v8 = vpack.c.bf16 %v652_v6, %v651_v1 }
 0x136   : > { %v659_v9 = vpack.c.bf16 %v650_v7, %v649_v4  ;;  %1784 = vmatpush3.bf16.msra.mxu1 %v658_v58 }
 0x137   : > { %1785 = vmatprep.subr.bf16.mxu1 %v2168_v16 }
 0x138   : > { %1661 = vmatprep.mubr.msk.bf16.mxu1 %vm700_vm3, %v659_v9 }
 0x139   : > { %1662 = vmatmul.mubr.msk.bf16.gmra.mrb[12].mxu1 %vm700_vm3, %v660_v8 }
 0x13a   : > { %1787 = vmatpush3.bf16.msra.mxu1 %v659_v9 }
 0x13b   : > { %1788 = vmatprep.subr.bf16.mxu1 %v2168_v16 }
 0x13e   : > { %1790 = vmatpush3.bf16.msra.mxu1 %v660_v8 }
 0x1f4   : > { %v1651_v11 = vpop.f32.mrb[0].mxu1 }
 0x1f5   : > { %v2473_v12 = vadd.f32 %v1651_v11, %v2470_v10  ;;  %v759_v13 = vpop.f32.mrb[1].mxu1 }
 0x1f6   : > { %v2476_v14 = vadd.f32 %v2470_v10, %v759_v13  ;;  %v1652_v15 = vpop.f32.mrb[2].mxu1 }
 0x1f7   : > { %v1524_v17 = vmul.f32 -1.442695, %v2473_v12  ;;  %v2480_v18 = vadd.f32 %v1652_v15, %v2470_v10  ;;  %v762_v19 = vpop.f32.mrb[3].mxu1 }
 0x1f8   : > { %v1522_v20 = vmul.f32 -1.442695, %v2476_v14  ;;  %v2484_v21 = vadd.f32 %v2470_v10, %v762_v19 }
 0x1f9   : > { %1914 = vpow2.f32 %v1524_v17  ;;  %v1525_v22 = vmul.f32 -1.442695, %v2480_v18 }
 0x1fa   : > { %1916 = vpow2.f32 %v1522_v20  ;;  %v1523_v23 = vmul.f32 -1.442695, %v2484_v21 }
 0x1fb   : > { %1918 = vpow2.f32 %v1525_v22 }
 0x1fc   : > { %v1655_v24 = vpop.f32.mrb[4].mxu1  ;;  %1920 = vpow2.f32 %v1523_v23 }
 0x1fd   : > { %v2489_v25 = vadd.f32 %v1655_v24, %v2470_v10  ;;  %v775_v26 = vpop.f32.mrb[5].mxu1 }
 0x1fe   : > { %v2492_v27 = vadd.f32 %v2470_v10, %v775_v26  ;;  %v1656_v28 = vpop.f32.mrb[6].mxu1 }
 0x1ff   : > { %v1528_v29 = vmul.f32 -1.442695, %v2489_v25  ;;  %v2496_v30 = vadd.f32 %v1656_v28, %v2470_v10  ;;  %v778_v31 = vpop.f32.mrb[7].mxu1 }
 0x200   : > { %v1526_v32 = vmul.f32 -1.442695, %v2492_v27  ;;  %v2500_v33 = vadd.f32 %v2470_v10, %v778_v31 }
 0x201   : > { %1922 = vpow2.f32 %v1528_v29  ;;  %v1529_v34 = vmul.f32 -1.442695, %v2496_v30 }
 0x202   : > { %1924 = vpow2.f32 %v1526_v32  ;;  %v1527_v38 = vmul.f32 -1.442695, %v2500_v33 }
 0x203   : > { %v1915_v35 = vpop.eup %1914  ;;  %1926 = vpow2.f32 %v1529_v34 }
 0x204   : > { %v1917_v36 = vpop.eup %1916  ;;  %v888_v37 = vadd.f32 1.0, %v1915_v35  ;;  %v1659_v39 = vpop.f32.mrb[8].mxu1 }
 0x205   : > { %v886_v40 = vadd.f32 1.0, %v1917_v36  ;;  %v2505_v41 = vadd.f32 %v1659_v39, %v2470_v10  ;;  %v791_v42 = vpop.f32.mrb[9].mxu1  ;;  %v1919_v43 = vpop.eup %1918 }
 0x206   : > { %1928 = vrcp.f32 %v888_v37  ;;  %v1660_v44 = vpop.f32.mrb[10].mxu1  ;;  %v889_v45 = vadd.f32 1.0, %v1919_v43  ;;  %v1921_v47 = vpop.eup %1920  ;;  %v2508_v48 = vadd.f32 %v2470_v10, %v791_v42 }
 0x207   : > { %1930 = vrcp.f32 %v886_v40  ;;  %v794_v46 = vpop.f32.mrb[11].mxu1  ;;  %v887_v49 = vadd.f32 1.0, %v1921_v47  ;;  %v1532_v50 = vmul.f32 -1.442695, %v2505_v41  ;;  %v2513_v54 = vadd.f32 %v1660_v44, %v2470_v10 }
 0x208   : > { %1932 = vpow2.f32 %v1527_v38  ;;  %v1530_v53 = vmul.f32 -1.442695, %v2508_v48  ;;  %v2516_v59 = vadd.f32 %v2470_v10, %v794_v46 }
 0x209   : > { %1934 = vrcp.f32 %v889_v45  ;;  %v1533_v0 = vmul.f32 -1.442695, %v2513_v54 }
 0x20a   : > { %1936 = vrcp.f32 %v887_v49  ;;  %v1531_v4 = vmul.f32 -1.442695, %v2516_v59 }
 0x20b   : > { %v1923_v51 = vpop.eup %1922  ;;  %1938 = vpow2.f32 %v1532_v50 }
 0x20c   : > { %v1925_v52 = vpop.eup %1924  ;;  %v1663_v55 = vpop.f32.mrb[12].mxu1  ;;  %v892_v56 = vadd.f32 1.0, %v1923_v51 }
 0x20d   : > { %v890_v57 = vadd.f32 1.0, %v1925_v52  ;;  %v807_v58 = vpop.f32.mrb[13].mxu1  ;;  %v1927_v61 = vpop.eup %1926  ;;  %v2520_v2 = vadd.f32 %v1663_v55, %v2470_v10 }
 0x20e   : > { %v1664_v60 = vpop.f32.mrb[14].mxu1  ;;  %v893_v5 = vadd.f32 1.0, %v1927_v61  ;;  %v2526_v7 = vadd.f32 %v2470_v10, %v807_v58  ;;  %v2172_v58 = vmov 0  }
 0x20f   : > { %1940 = vrcp.f32 %v890_v57  ;;  %v810_v62 = vpop.f32.mrb[15].mxu1  ;;  %v1536_v11 = vmul.f32 -1.442695, %v2520_v2  ;;  %v2533_v17 = vadd.f32 %v1664_v60, %v2470_v10  ;;  %v1015_v57 = vld [vmem:[%s2766_s7] sm:$0xf]  ;;  %1898 = vset.pattern.permute.xlu0 %v2172_v58  ;;  %1899 = vset.pattern.permute.xlu1 %v2172_v58  ;;  %v1150_v58 = vstv %s2373_s17 }
 0x210   : > { %v1929_v63 = vpop.eup %1928  ;;  %1942 = vpow2.f32 %v1530_v53  ;;  %v1534_v15 = vmul.f32 -1.442695, %v2526_v7  ;;  %v2536_v20 = vadd.f32 %v2470_v10, %v810_v62 }
 0x211   : > { %v1931_v1 = vpop.eup %1930  ;;  %1944 = vrcp.f32 %v892_v56  ;;  %954 = vrot.lane.b32.xlu1 %v1929_v63, %s2169_s29  ;;  %v1537_v28 = vmul.f32 -1.442695, %v2533_v17  ;;  %v2171_v56 = vmov 0.0  }
 0x212   : > { %v1933_v3 = vpop.eup %1932  ;;  %950 = vrot.lane.b32.xlu0 %v1931_v1, %s2169_s29  ;;  %1946 = vpow2.f32 %v1533_v0  ;;  %v1535_v29 = vmul.f32 -1.442695, %v2536_v20  ;;  %1697 = vmatprep.mubr.msk.f32.mxu0 %vm2170_vm4, %v2171_v56 }
 0x213   : > { %v891_v6 = vadd.f32 1.0, %v1933_v3  ;;  %v1935_v8 = vpop.eup %1934  ;;  %1732 = vmatprep.mubr.msk.f32.mxu1 %vm2170_vm4, %v2171_v56  ;;  %v1148_v56 = vstv %s1556_s12 }
 0x214   : > { %v1937_v9 = vpop.eup %1936 }
 0x215   : > { %1948 = vrcp.f32 %v891_v6  ;;  %956 = vrot.lane.b32.xlu1 %v1935_v8, %s2169_s29  ;;  %v1939_v13 = vpop.eup %1938 }
 0x216   : > { %1950 = vpow2.f32 %v1531_v4  ;;  %952 = vrot.lane.b32.xlu0 %v1937_v9, %s2169_s29  ;;  %v896_v23 = vadd.f32 1.0, %v1939_v13 }
 0x217   : > { %1952 = vrcp.f32 %v893_v5 }
 0x218   : > { %1954 = vpow2.f32 %v1536_v11 }
 0x219   : > { %v1941_v19 = vpop.eup %1940  ;;  %1956 = vpow2.f32 %v1534_v15 }
 0x21a   : > { %v1943_v22 = vpop.eup %1942  ;;  %958 = vrot.lane.b32.xlu0 %v1941_v19, %s2169_s29 }
 0x21b   : > { %v1945_v24 = vpop.eup %1944  ;;  %v894_v26 = vadd.f32 1.0, %v1943_v22 }
 0x21c   : > { %v1947_v31 = vpop.eup %1946 }
 0x21d   : > { %1958 = vrcp.f32 %v894_v26  ;;  %v897_v35 = vadd.f32 1.0, %v1947_v31 }
 0x21e   : > { %1960 = vrcp.f32 %v896_v23  ;;  %962 = vrot.lane.b32.xlu0 %v1945_v24, %s2169_s29 }
 0x21f   : > { %v1949_v32 = vpop.eup %1948  ;;  %1962 = vpow2.f32 %v1537_v28 }
 0x220   : > { %v1951_v10 = vpop.eup %1950  ;;  %960 = vrot.lane.b32.xlu1 %v1949_v32, %s2169_s29  ;;  %1964 = vpow2.f32 %v1535_v29 }
 0x221   : > { %v1953_v34 = vpop.eup %1952  ;;  %v895_v36 = vadd.f32 1.0, %v1951_v10 }
 0x222   : > { %v1955_v37 = vpop.eup %1954 }
 0x223   : > { %1966 = vrcp.f32 %v895_v36  ;;  %v1957_v38 = vpop.eup %1956  ;;  %v900_v39 = vadd.f32 1.0, %v1955_v37 }
 0x224   : > { %964 = vrot.lane.b32.xlu1 %v1953_v34, %s2169_s29  ;;  %1968 = vrcp.f32 %v897_v35  ;;  %v898_v40 = vadd.f32 1.0, %v1957_v38 }
 0x226   : > { %1970 = vrcp.f32 %v898_v40 }
 0x227   : > { %v1959_v42 = vpop.eup %1958  ;;  %1972 = vrcp.f32 %v900_v39 }
 0x228   : > { %v1961_v43 = vpop.eup %1960  ;;  %966 = vrot.lane.b32.xlu0 %v1959_v42, %s2169_s29 }
 0x229   : > { %v1963_v44 = vpop.eup %1962 }
 0x22a   : > { %v1965_v45 = vpop.eup %1964  ;;  %v901_v46 = vadd.f32 1.0, %v1963_v44 }
 0x22b   : > { %v899_v47 = vadd.f32 1.0, %v1965_v45 }
 0x22c   : > { %970 = vrot.lane.b32.xlu0 %v1961_v43, %s2169_s29 }
 0x22d   : > { %v1967_v49 = vpop.eup %1966  ;;  %1974 = vrcp.f32 %v899_v47 }
 0x22e   : > { %968 = vrot.lane.b32.xlu1 %v1967_v49, %s2169_s29  ;;  %v1969_v50 = vpop.eup %1968  ;;  %1976 = vrcp.f32 %v901_v46 }
 0x22f   : > { %1978 = vtanh.f32 %v2473_v12 }
 0x230   : > { %v1971_v51 = vpop.eup %1970  ;;  %1980 = vtanh.f32 %v2476_v14 }
 0x231   : > { %974 = vrot.lane.b32.xlu0 %v1971_v51, %s2169_s29  ;;  %v1973_v52 = vpop.eup %1972  ;;  %1982 = vtanh.f32 %v2480_v18 }
 0x232   : > { %972 = vrot.lane.b32.xlu1 %v1969_v50, %s2169_s29  ;;  %1984 = vtanh.f32 %v2484_v21 }
 0x233   : > { %1986 = vtanh.f32 %v2492_v27 }
 0x234   : > { %1988 = vtanh.f32 %v2500_v33 }
 0x235   : > { %978 = vrot.lane.b32.xlu0 %v1973_v52, %s2169_s29  ;;  %1990 = vtanh.f32 %v2489_v25  ;;  %v1014_v52 = vld [vmem:[%s2769_s3] sm:$0xf] }
 0x236   : > { %1992 = vtanh.f32 %v2496_v30 }
 0x237   : > { %v1975_v53 = vpop.eup %1974  ;;  %1994 = vtanh.f32 %v2508_v48 }
 0x238   : > { %976 = vrot.lane.b32.xlu1 %v1975_v53, %s2169_s29  ;;  %v1977_v55 = vpop.eup %1976  ;;  %1996 = vtanh.f32 %v2516_v59  ;;  %v1146_v53 = vlaneseq }
 0x239   : > { %1018 = vperm.xlu0 %1898, %v1015_v57   ;;  %v1979_v62 = vpop.eup %1978  ;;  %1998 = vtanh.f32 %v2505_v41 }
 0x23a   : > { %v1981_v63 = vpop.eup %1980  ;;  %2000 = vtanh.f32 %v2513_v54 }
 0x23b   : > { %v1983_v0 = vpop.eup %1982  ;;  %2002 = vtanh.f32 %v2526_v7 }
 0x23c   : > { %980 = vrot.lane.b32.xlu1 %v1977_v55, %s2169_s29  ;;  %v1985_v3 = vpop.eup %1984  ;;  %2004 = vtanh.f32 %v2536_v20  ;;  %v1147_v55 = vand.u32 127, %v1146_v53 }
 0x23d   : > { %v1987_v33 = vpop.eup %1986  ;;  %2006 = vtanh.f32 %v2520_v2 }
 0x23e   : > { %v1989_v9 = vpop.eup %1988  ;;  %2008 = vtanh.f32 %v2533_v17  ;;  %v1149_v57 = vadd.s32 %v1148_v56, %v1147_v55 }
 0x23f   : > { %v1991_v22 = vpop.eup %1990 }
 0x240   : > { %v1993_v25 = vpop.eup %1992  ;;  %vm1151_vm6 = vcmp.lt.s32.totalorder %v1149_v57, %v1150_v58 }
 0x241   : > { %v1995_v48 = vpop.eup %1994 }
 0x242   : > { %v1997_v31 = vpop.eup %1996 }
 0x243   : > { %v1999_v41 = vpop.eup %1998 }
 0x244   : > { %v2001_v36 = vpop.eup %2000 }
 0x245   : > { %v2003_v39 = vpop.eup %2002 }
 0x246   : > { %v2005_v40 = vpop.eup %2004 }
 0x247   : > { %v2007_v2 = vpop.eup %2006 }
 0x248   : > { %v2009_v46 = vpop.eup %2008 }
 0x283   : > { %v955_v60 = vpop.permute.xlu1 %954 }
 0x284   : > { %v951_v61 = vpop.permute.xlu0 %950  ;;  %v1000_v4 = vmul.f32 %v1979_v62, %v955_v60 }
 0x285   : > { %v998_v6 = vmul.f32 %v1981_v63, %v951_v61 }
 0x287   : > { %v957_v1 = vpop.permute.xlu1 %956 }
 0x288   : > { %v1001_v5 = vmul.f32 %v1983_v0, %v957_v1  ;;  %v953_v12 = vpop.permute.xlu0 %952  ;;  %v1155_v1 = vld [vmem:[#allocation2] sm:$0xf] }
 0x289   : > { %v999_v14 = vmul.f32 %v1985_v3, %v953_v12 }
 0x28a   : > { %v1740_v8 = vpack.c.bf16 %v1001_v5, %v1000_v4 }
 0x28b   : > { %v1736_v21 = vpack.c.bf16 %v999_v14, %v998_v6 }
 0x28c   : > { %v959_v27 = vpop.permute.xlu0 %958 }
 0x28d   : > { %1738 = vmatpush3.bf16.xpose.msk.msra.mxu0 %vm2563_vm5, %v1736_v21  ;;  %v1002_v13 = vmul.f32 %v1987_v33, %v959_v27 }
 0x28e   : > { %1739 = vmatprep.subr.bf16.mxu0 %v2168_v16 }
 0x290   : > { %v963_v19 = vpop.permute.xlu0 %962 }
 0x291   : > { %v1004_v24 = vmul.f32 %v1991_v22, %v963_v19  ;;  %v1182_v19 = vld [vmem:[#allocation4] sm:$0xf] }
 0x292   : > { %v961_v11 = vpop.permute.xlu1 %960 }
 0x293   : > { %v1003_v15 = vmul.f32 %v1989_v9, %v961_v11  ;;  %v1174_v9 = vld [vmem:[#allocation3] sm:$0xf] }
 0x295   : > { %v1744_v23 = vpack.c.bf16 %v1003_v15, %v1002_v13  ;;  %1742 = vmatpush3.bf16.xpose.msk.msra.mxu0 %vm2563_vm5, %v1740_v8 }
 0x296   : > { %v965_v30 = vpop.permute.xlu1 %964  ;;  %1743 = vmatprep.subr.bf16.mxu0 %v2168_v16 }
 0x297   : > { %v1005_v26 = vmul.f32 %v1993_v25, %v965_v30 }
 0x299   : > { %v1748_v28 = vpack.c.bf16 %v1005_v26, %v1004_v24 }
 0x29a   : > { %v967_v29 = vpop.permute.xlu0 %966 }
 0x29b   : > { %v1006_v32 = vmul.f32 %v1995_v48, %v967_v29 }
 0x29d   : > { %1746 = vmatpush3.bf16.xpose.msk.msra.mxu0 %vm2563_vm5, %v1744_v23 }
 0x29e   : > { %1747 = vmatprep.subr.bf16.mxu0 %v2168_v16  ;;  %v971_v34 = vpop.permute.xlu0 %970 }
 0x29f   : > { %v1008_v37 = vmul.f32 %v1999_v41, %v971_v34 }
 0x2a0   : > { %v969_v59 = vpop.permute.xlu1 %968 }
 0x2a1   : > { %v1007_v10 = vmul.f32 %v1997_v31, %v969_v59 }
 0x2a3   : > { %v1752_v35 = vpack.c.bf16 %v1007_v10, %v1006_v32  ;;  %v975_v20 = vpop.permute.xlu0 %974 }
 0x2a4   : > { %v973_v54 = vpop.permute.xlu1 %972  ;;  %v1010_v43 = vmul.f32 %v2003_v39, %v975_v20 }
 0x2a5   : > { %v1009_v38 = vmul.f32 %v2001_v36, %v973_v54  ;;  %1750 = vmatpush3.bf16.xpose.msk.msra.mxu0 %vm2563_vm5, %v1748_v28 }
 0x2a6   : > { %1751 = vmatprep.subr.bf16.mxu0 %v2168_v16 }
 0x2a7   : > { %v1756_v7 = vpack.c.bf16 %v1009_v38, %v1008_v37  ;;  %v979_v45 = vpop.permute.xlu0 %978 }
 0x2a8   : > { %v1012_v49 = vmul.f32 %v2007_v2, %v979_v45 }
 0x2aa   : > { %v977_v42 = vpop.permute.xlu1 %976 }
 0x2ab   : > { %v1011_v44 = vmul.f32 %v2005_v40, %v977_v42 }
 0x2ad   : > { %1754 = vmatpush3.bf16.xpose.msk.msra.mxu0 %vm2563_vm5, %v1752_v35  ;;  %v1760_v17 = vpack.c.bf16 %v1011_v44, %v1010_v43 }
 0x2ae   : > { %1755 = vmatprep.subr.bf16.mxu0 %v2168_v16  ;;  %v981_v47 = vpop.permute.xlu1 %980 }
 0x2af   : > { %v1013_v50 = vmul.f32 %v2009_v46, %v981_v47 }
 0x2b1   : > { %v1764_v51 = vpack.c.bf16 %v1013_v50, %v1012_v49 }
 0x2b5   : > { %1758 = vmatpush3.bf16.xpose.msk.msra.mxu0 %vm2563_vm5, %v1756_v7 }
 0x2b6   : > { %1759 = vmatprep.subr.bf16.mxu0 %v2168_v16 }
 0x2b8   : > { %v1019_v60 = vpop.permute.xlu0 %1018 }
 0x2bd   : > { %1762 = vmatpush3.bf16.xpose.msk.msra.mxu0 %vm2563_vm5, %v1760_v17 }
 0x2be   : > { %1763 = vmatprep.subr.bf16.mxu0 %v2168_v16 }
 0x2c5   : > { %1766 = vmatpush3.bf16.xpose.msk.msra.mxu0 %vm2563_vm5, %v1764_v51 }
 0x2cc   : > { %1698 = vmatmul.mubr.msk.f32.vlgmr.msra.gmra.mrb[16].mxu0 %vm515_vm2, %v1014_v52 }
 0x39f   : > { %v1138_v61 = vpop.f32.mrb[16].mxu0 }
 0x3a0   : > { %v1139_v16 = vadd.f32 %v1138_v61, %v1019_v60  ;;  %v1699_v62 = vpop.f32.mrb[17].mxu0 }
 0x3a2   : > { %1142 = vst [vmem:[%s404_s19] sm:$0xf] %v1139_v16  ;;  %v1154_v63 = vsel %vm1151_vm6, %v1139_v16, -inf }
 0x3a3   : > { %v1157_v0 = vsel %vm1156_vm7, %v1154_v63, -inf }
 0x3a4   : > { %1158 = vmax.xlane.f32.xlu1 %v1157_v0 }
 0x431   : > { %v1159_v3 = vpop.xlane.xlu1 %1158 }
 0x432   : > { %v1160_v4 = vmax.f32 %v1155_v1, %v1159_v3 }
 0x434   : > { %1262 = vst.msk [vmem:[#allocation2] sm:$0xf] %vm1180_vm8, %v1160_v4  ;;  %vm1161_vm9 = vcmp.eq.f32.partialorder %v1160_v4, -inf }
 0x435   : > { %v1162_v5 = vsel %vm1161_vm9, 0.0, %v1160_v4 }
 0x436   : > { %1168 = vperm.xlu0 %1898, %v1162_v5   ;;  %v1163_v12 = vsub.f32 %v1155_v1, %v1162_v5 }
 0x438   : > { %v1164_v6 = vmul.f32 1.442695, %v1163_v12 }
 0x43a   : > { %2010 = vpow2.f32 %v1164_v6 }
 0x43b   : > { %v1267_v26 = vld [vmem:[#allocation2] sm:$0xf] (!%p1557_p8) }
 0x43c   : > { %1268 = vst.msk [vmem:[%s2380_s0] sm:$0xf] (!%p1557_p8), %vm1180_vm8, %v1267_v26 }
 0x444   : > { %v2011_v14 = vpop.eup %2010 }
 0x445   : > { %1185 = vperm.xlu1 %1899, %v2011_v14   ;;  %v1175_v11 = vmul.f32 %v2011_v14, %v1174_v9 }
 0x4b5   : > { %v1169_v8 = vpop.permute.xlu0 %1168 }
 0x4b6   : > { %v1171_v18 = vsub.f32 %v1154_v63, %v1169_v8 }
 0x4b8   : > { %v1172_v21 = vmul.f32 1.442695, %v1171_v18 }
 0x4ba   : > { %2012 = vpow2.f32 %v1172_v21 }
 0x4c4   : > { %v2013_v27 = vpop.eup %2012  ;;  %v1186_v22 = vpop.permute.xlu1 %1185 }
 0x4c5   : > { %1733 = vmatmul.mubr.f32.vlgmr.msra.gmra.mrb[16].mxu1 %v2013_v27  ;;  %v1176_v33 = vsel %vm1156_vm7, %v2013_v27, 0.0  ;;  %v1188_v23 = vmul.f32 %v1186_v22, %v1182_v19 }
 0x4c6   : > { %1177 = vadd.xlane.f32.xlu0 %v1176_v33 }
 0x553   : > { %v1178_v13 = vpop.xlane.xlu0 %1177 }
 0x554   : > { %v1179_v15 = vadd.f32 %v1178_v13, %v1175_v11 }
 0x556   : > { %1181 = vst.msk [vmem:[#allocation3] sm:$0xf] %vm1180_vm8, %v1179_v15 }
 0x55d   : > { %v1269_v28 = vld [vmem:[#allocation3] sm:$0xf] (!%p1557_p8) }
 0x55e   : > { %1270 = vst.msk [vmem:[%s2390_s21] sm:$0xf] (!%p1557_p8), %vm1180_vm8, %v1269_v28 }
 0x595   : > { %1266 = sbr.rel (%p1557_p8) target bundleno = 1444 (0x5a4), region = 56 }
 0x598   : > { %v1255_v25 = vpop.f32.mrb[16].mxu1 }
 0x599   : > { %v1259_v30 = vadd.f32 %v1255_v25, %v1188_v23  ;;  %v1734_v24 = vpop.f32.mrb[17].mxu1 }
 0x59b   : > { %1261 = vst.msk [vmem:[#allocation4] sm:$0xf] %vm1260_vm10, %v1259_v30 }
 0x5a2   : > { %v1271_v29 = vld [vmem:[#allocation4] sm:$0xf] }
 0x5a3   : > { %1272 = vst.msk [vmem:[%s397_s18] sm:$0xf] %vm1260_vm10, %v1271_v29 }
 0x5a4 PF: > { %s1560_s13 = sshll.u32 %s2152_s26, 6  ;;  %s2771_s10 = sld [smem:[#allocation29_spill]] }
 0x5a5   : > { %s1306_s30 = sshll.u32 %s397_s18, 4  ;;  %s2772_s15 = sand.u32 1, %s2140_s23   ;;  %s1307_s30 = int_to_ptr.vmem [resolvable:$true] %s1306_s30 }
 0x5a6   : > { %s1282_s0 = scalar_lea.sflag [#allocation8], %s2772_s15  ;;  %s2014_s7 = scalar_lea.vmem %s1307_s30, 64 }
 0x5a7   : > { %p2015_p9 = scmp.ne.s32.totalorder %s1307_s30, %s2014_s7  ;;  %s2173_s21 = smov [#allocation7]  }
 0x5a8   : > { %s2018_s27 = sshll.u32 %s2173_s21, 4  ;;  %s2019_s27 = int_to_ptr.vmem [resolvable:$false] %s2018_s27 }
 0x5a9   : > { %p2016_p10 = pnand %p2015_p9, %p2309_p3  ;;  %s2020_s24 = scalar_lea.vmem %s2019_s27, 128 }
 0x5aa   : > { %s2623_s29 = scalar_lea.hbm %s2771_s10, %s1560_s13  ;;  %p2021_p13 = scmp.lt.s32.totalorder %s1307_s30, %s2019_s27 }
 0x5ab   : > { %p2017_p12 = pneg %p2016_p10  ;;  %p2022_p1 = scmp.lt.s32.totalorder %s2020_s24, %s2014_s7 }
 0x5ad   : > { %p2023_p4 = por %p2022_p1, %p2021_p13 }
 0x5af   : > { %p2024_p2 = pnand %p2023_p4, %p2017_p12 }
 0x5b1   : > { %2027 = shalt.err (!%p2024_p2)
}
 0x5b2   : > { %s2028_s26 = scalar_lea.hbm %s2623_s29, 64  ;;  %s2032_s3 = scalar_lea.hbm %s2771_s10, 128 }
 0x5b3   : > { %p2029_p5 = scmp.ne.s32.totalorder %s2623_s29, %s2028_s26  ;;  %p2033_p9 = scmp.lt.u32.totalorder %s2623_s29, %s2771_s10 }
 0x5b4   : > { %p2034_p10 = scmp.lt.u32.totalorder %s2032_s3, %s2028_s26  ;;  %p2036_p13 = scmp.lt.u32.totalorder %s2028_s26, %s2623_s29 }
 0x5b5   : > { %p2030_p6 = pnand %p2029_p5, %p2309_p3 }
 0x5b6   : > { %p2035_p12 = por %p2034_p10, %p2033_p9 }
 0x5b7   : > { %p2031_p8 = pneg %p2030_p6 }
 0x5b8   : > { %p2037_p1 = por %p2036_p13, %p2035_p12 }
 0x5ba   : > { %p2038_p4 = pnand %p2037_p1, %p2031_p8 }
 0x5bc   : > { %2041 = shalt.err (!%p2038_p4)
}
 0x5bd   : > { %1791 = dma.vmem_to_hbm [thread:$0]  (%p2309_p3), %s1307_s30, 64, %s2623_s29, %s1282_s0  }
 0x5be   : > { %s1562_s25 = sshll.u32 %s2371_s16, 6  ;;  %s1321_s6 = sshll.u32 %s404_s19, 4  ;;  %s1322_s6 = int_to_ptr.vmem [resolvable:$true] %s1321_s6 }
 0x5bf   : > { %s2773_s21 = sld [smem:[#allocation30_spill]]  ;;  %s2775_s24 = sand.u32 1, %s2128_s20  }
 0x5c0   : > { %s1287_s26 = scalar_lea.sflag [#allocation10], %s2775_s24  ;;  %s2042_s11 = scalar_lea.vmem %s1322_s6, 64 }
 0x5c1   : > { %p2043_p2 = scmp.ne.s32.totalorder %s1322_s6, %s2042_s11  ;;  %s2174_s17 = smov [#allocation9]  }
 0x5c2   : > { %s2046_s3 = sshll.u32 %s2174_s17, 4  ;;  %s2047_s3 = int_to_ptr.vmem [resolvable:$false] %s2046_s3 }
 0x5c3   : > { %p2044_p5 = pnand %p2043_p2, %p2341_p11  ;;  %s2048_s29 = scalar_lea.vmem %s2047_s3, 128 }
 0x5c4   : > { %p2049_p3 = scmp.lt.s32.totalorder %s1322_s6, %s2047_s3  ;;  %p2050_p8 = scmp.lt.s32.totalorder %s2048_s29, %s2042_s11 }
 0x5c5   : > { %s2774_s18 = smov %s2773_s21  ;;  %s2652_s27 = scalar_lea.hbm %s2773_s21, %s1562_s25 }
 0x5c6   : > { %p2045_p6 = pneg %p2044_p5  ;;  %p2051_p9 = por %p2050_p8, %p2049_p3 }
 0x5c8   : > { %p2052_p10 = pnand %p2051_p9, %p2045_p6 }
 0x5ca   : > { %2055 = shalt.err (!%p2052_p10)
}
 0x5cb   : > { %s2056_s19 = scalar_lea.hbm %s2652_s27, 64  ;;  %s2060_s30 = scalar_lea.hbm %s2774_s18, 256 }
 0x5cc   : > { %p2057_p12 = scmp.ne.s32.totalorder %s2652_s27, %s2056_s19  ;;  %p2061_p4 = scmp.lt.u32.totalorder %s2652_s27, %s2774_s18 }
 0x5cd   : > { %p2062_p2 = scmp.lt.u32.totalorder %s2060_s30, %s2056_s19  ;;  %p2064_p6 = scmp.lt.u32.totalorder %s2056_s19, %s2652_s27 }
 0x5ce   : > { %p2058_p13 = pnand %p2057_p12, %p2341_p11 }
 0x5cf   : > { %p2063_p5 = por %p2062_p2, %p2061_p4 }
 0x5d0   : > { %p2059_p1 = pneg %p2058_p13 }
 0x5d1   : > { %p2065_p3 = por %p2064_p6, %p2063_p5 }
 0x5d3   : > { %p2066_p8 = pnand %p2065_p3, %p2059_p1 }
 0x5d5   : > { %2069 = shalt.err (!%p2066_p8)
}
 0x5d6   : > { %1792 = dma.vmem_to_hbm [thread:$0]  (%p2341_p11), %s1322_s6, 64, %s2652_s27, %s1287_s26  }
 0x5d7 PF: > { %s2776_s13 = sld [smem:[#allocation15_spill]]  ;;  %p1802_p9 = scmp.ge.s32.totalorder %s2164_s28, 2 }
 0x5d9   : > { %p1796_p10 = pnand %p1802_p9, %p2325_p7 }
 0x5dd   : > { %s1347_s25 = sand.u32 1, %s2776_s13  }
 0x5de   : > { %s1348_s15 = scalar_lea.sflag [#allocation8], %s1347_s25 }
 0x5df   : > { %2115 = dma.done.wait (!%p1796_p10), %s1348_s15, 64  }
 0x5e0   : > { %2117 = vsyncadd (!%p1796_p10), %s1348_s15, 4294967232  ;;  %s2777_s7 = sld [smem:[#allocation13_spill]]  ;;  %p1799_p12 = pnand %p1802_p9, %p2353_p0 }
 0x5e6   : > { %s1356_s24 = sand.u32 1, %s2777_s7  }
 0x5e7   : > { %s1357_s11 = scalar_lea.sflag [#allocation10], %s1356_s24 }
 0x5e8   : > { %2119 = dma.done.wait (!%p1799_p12), %s1357_s11, 64  }
 0x5e9   : > { %2121 = vsyncadd (!%p1799_p12), %s1357_s11, 4294967232  ;;  %s29_s28 = sadd.s32 1, %s2164_s28   ;;  %s2779_s5 = sld [smem:[#allocation14_spill]] }
 0x5ea   : > { %p26_p11 = scmp.ge.s32.totalorder %s29_s28, 6   ;;  %s2780_s21 = sld [smem:[#allocation23_spill]] }
 0x5eb   : > { %s2781_s6 = sld [smem:[#allocation16_spill]]  ;;  %s2782_s24 = sld [smem:[#allocation22_spill]] }
 0x5ec   : > { %s2783_s25 = sld [smem:[#allocation17_spill]]  ;;  %s2784_s26 = sld [smem:[#allocation18_spill]] }
 0x5ed   : > { %s2785_s0 = sld [smem:[#allocation19_spill]]  ;;  %s2786_s27 = sld [smem:[#allocation21_spill]] }
 0x5ee   : > { %s2787_s19 = smov %s2128_s20  ;;  %s2789_s22 = smov %s2140_s23 }
 0x5ef   : > { %s2788_s20 = smov %s2779_s5  ;;  %28 = sbr.rel (!%p26_p11) target bundleno = 17 (0x11), region = 132 }
 0x5f1   : > { %s2790_s23 = smov %s2781_s6 }
 0x5f6   :  { %1362 = vsyncpa [#allocation8], 1 }
 0x5f7   :  { %1364 = vsyncpa [#allocation8 + $0x1], 1 }
 0x5f8   :  { %1365 = vsyncpa [#allocation10], 1 }
 0x5f9   :  { %1367 = vsyncpa [#allocation10 + $0x1], 1 }

</bundles_post_ra>
